<compile_context>
chip_gen: v5e
topology: v5e:2x2
jax: 0.10.0
libtpu: 0.0.40
codegen_flags: <defaults>
</compile_context>

<pallas_src>
import functools

import jax
import jax.numpy as jnp
from jax.experimental import pallas as pl
from jax.experimental.pallas import tpu as pltpu


def sac_q_kernel(x_ref, we_ref, w1_ref, w2_ref, bias_ref, q_ref, *, hidden):
    H = hidden
    # Fused embeddings:
    #   [s_emb | a_emb] = ReLU([state|action] @ blockdiag(Ws, Wa) + [bs|ba])
    emb = jnp.maximum(
        jnp.dot(x_ref[...], we_ref[...], preferred_element_type=jnp.float32)
        + bias_ref[:, 0:2 * H],
        0.0)
    # embed_to_q layer 1: ReLU(cat @ W1 + b1); `emb` already IS the concatenation.
    h = jnp.maximum(
        jnp.dot(emb, w1_ref[...], preferred_element_type=jnp.float32)
        + bias_ref[:, 2 * H:3 * H],
        0.0)
    # embed_to_q layer 2: q = h @ W2 + b2.
    # N=1 matmul would waste the MXU -> do it as VPU multiply + XLU lane-reduce.
    q_ref[...] = (jnp.sum(h * w2_ref[...], axis=-1, keepdims=True)
                  + bias_ref[:, 3 * H:3 * H + 1])


def sac_qnet_forward(state, action, packed):
    """Fused forward pass of SACQNet. Returns (q_values, stats_dict)."""
    B = state.shape[0]
    SA = state.shape[1] + action.shape[1]
    H = packed["W1"].shape[1]

    # Pack [state | action] into one lane-contiguous input (offline concat).
    x = jnp.concatenate([state, action], axis=-1).astype(jnp.float32)

    # Batch tiling: 128-row blocks for training-sized batches (parallel across
    # TensorCores on v7x), single full-array block for tiny batches.
    block_b = 128 if (B % 128 == 0) else B
    grid = (B // block_b,)

    q = pl.pallas_call(
        functools.partial(sac_q_kernel, hidden=H),
        out_shape=jax.ShapeDtypeStruct((B, 1), jnp.float32),
        grid_spec=pltpu.PrefetchScalarGridSpec(
            num_scalar_prefetch=0,
            grid=grid,
            in_specs=[
                pl.BlockSpec((block_b, SA), lambda i: (i, 0)),       # [state|action]
                pl.BlockSpec((SA, 2 * H), lambda i: (0, 0)),         # blockdiag(Ws, Wa)
                pl.BlockSpec((2 * H, H), lambda i: (0, 0)),          # W1 (un-split)
                pl.BlockSpec((1, H), lambda i: (0, 0)),              # W2 as a row
                pl.BlockSpec((1, 3 * H + 1), lambda i: (0, 0)),      # [bs|ba|b1|b2]
            ],
            out_specs=pl.BlockSpec((block_b, 1), lambda i: (i, 0)),
        ),
        compiler_params=pltpu.CompilerParams(
            dimension_semantics=("parallel",)),
    )(x, packed["We"], packed["W1"], packed["w2"], packed["bias"])
    return q, {}


def make_params(key, state_dim, action_dim, hidden):
    """Logical (PyTorch-layout-equivalent) parameters, weights as [in, out]."""
    ks = jax.random.split(key, 8)
    scale = 0.1
    return {
        "Ws": scale * jax.random.normal(ks[0], (state_dim, hidden), jnp.float32),
        "bs": scale * jax.random.normal(ks[1], (1, hidden), jnp.float32),
        "Wa": scale * jax.random.normal(ks[2], (action_dim, hidden), jnp.float32),
        "ba": scale * jax.random.normal(ks[3], (1, hidden), jnp.float32),
        "W1": scale * jax.random.normal(ks[4], (2 * hidden, hidden), jnp.float32),
        "b1": scale * jax.random.normal(ks[5], (1, hidden), jnp.float32),
        "W2": scale * jax.random.normal(ks[6], (hidden, 1), jnp.float32),
        "b2": scale * jax.random.normal(ks[7], (1, 1), jnp.float32),
    }


def pack_params(p, state_dim, action_dim, hidden):
    """Offline repack of the logical params into the 4 kernel weight operands."""
    SA = state_dim + action_dim
    # Block-diagonal embed weight: [state|action] @ We == [state@Ws | action@Wa].
    We = jnp.zeros((SA, 2 * hidden), jnp.float32)
    We = We.at[:state_dim, :hidden].set(p["Ws"])
    We = We.at[state_dim:, hidden:].set(p["Wa"])
    # All biases in one lane row: [bs(H) | ba(H) | b1(H) | b2(1)].
    bias = jnp.concatenate([p["bs"], p["ba"], p["b1"], p["b2"]], axis=-1)
    return {
        "We": We,                        # (SA, 2H)
        "W1": p["W1"],                   # (2H, H)
        "w2": p["W2"].T,                 # (1, H)
        "bias": bias,                    # (1, 3H + 1)
    }


def reference_forward(state, action, p):
    """Pure-JAX reference matching the PyTorch module semantics."""
    s_emb = jnp.maximum(state @ p["Ws"] + p["bs"], 0.0)
    a_emb = jnp.maximum(action @ p["Wa"] + p["ba"], 0.0)
    cat = jnp.concatenate([s_emb, a_emb], axis=-1)
    h = jnp.maximum(cat @ p["W1"] + p["b1"], 0.0)
    return h @ p["W2"] + p["b2"]


if __name__ == "__main__":
    B, STATE_DIM, ACTION_DIM, HIDDEN = 8, 16, 8, 32

    key = jax.random.PRNGKey(0)
    k_state, k_action, k_params = jax.random.split(key, 3)

    state = jax.random.normal(k_state, (B, STATE_DIM), jnp.float32)
    action = jax.random.normal(k_action, (B, ACTION_DIM), jnp.float32)

    params = make_params(k_params, STATE_DIM, ACTION_DIM, HIDDEN)
    packed = pack_params(params, STATE_DIM, ACTION_DIM, HIDDEN)

    q, stats = sac_qnet_forward(state, action, packed)
    q = jax.block_until_ready(q)

    q_ref = reference_forward(state, action, params)
    assert q.shape == (B, 1)
    assert isinstance(stats, dict)
    assert jnp.allclose(q, q_ref, atol=1e-5, rtol=1e-5), "mismatch vs reference"

    print("KERNEL_OK")
</pallas_src>

<mosaic_0001>
module attributes {stable_mosaic.version = 11 : i64} {
  func.func @sac_q_kernel(%arg0: i32, %arg1: memref<8x24xf32, #tpu.memory_space<vmem>>, %arg2: memref<24x64xf32, #tpu.memory_space<vmem>>, %arg3: memref<64x32xf32, #tpu.memory_space<vmem>>, %arg4: memref<1x32xf32, #tpu.memory_space<vmem>>, %arg5: memref<1x97xf32, #tpu.memory_space<vmem>>, %arg6: memref<8x1xf32, #tpu.memory_space<vmem>>) attributes {dimension_semantics = [#tpu.dimension_semantics<parallel>], iteration_bounds = array<i64: 1>, scalar_prefetch = 0 : i64, scratch_operands = 0 : i64, tpu.core_type = #tpu.core_type<tc>, window_params = [{transform_indices = @transform_0, window_bounds = array<i64: 8, 24>}, {pipeline_mode = #tpu.pipeline_mode<synchronous>, transform_indices = @transform_1, window_bounds = array<i64: 24, 64>}, {pipeline_mode = #tpu.pipeline_mode<synchronous>, transform_indices = @transform_2, window_bounds = array<i64: 64, 32>}, {pipeline_mode = #tpu.pipeline_mode<synchronous>, transform_indices = @transform_3, window_bounds = array<i64: 1, 32>}, {pipeline_mode = #tpu.pipeline_mode<synchronous>, transform_indices = @transform_4, window_bounds = array<i64: 1, 97>}, {transform_indices = @transform_5, window_bounds = array<i64: 8, 1>}]} {
    %c0 = arith.constant 0 : index
    %c0_0 = arith.constant 0 : index
    %0 = vector.load %arg1[%c0, %c0_0] : memref<8x24xf32, #tpu.memory_space<vmem>>, vector<8x24xf32>
    %c0_1 = arith.constant 0 : index
    %c0_2 = arith.constant 0 : index
    %1 = vector.load %arg2[%c0_1, %c0_2] : memref<24x64xf32, #tpu.memory_space<vmem>>, vector<24x64xf32>
    %cst = arith.constant dense<0.000000e+00> : vector<8x64xf32>
    %2 = tpu.matmul %0, %1, %cst {dimension_numbers = #tpu.dot_dimension_numbers<[1], [0], [0], [1], [0, 0, 1, 1], [], []>} : vector<8x24xf32>, vector<24x64xf32>, vector<8x64xf32> -> vector<8x64xf32>
    %c0_3 = arith.constant 0 : index
    %c0_4 = arith.constant 0 : index
    %3 = vector.load %arg5[%c0_3, %c0_4] : memref<1x97xf32, #tpu.memory_space<vmem>>, vector<1x64xf32>
    %4 = vector.broadcast %3 : vector<1x64xf32> to vector<8x64xf32>
    %5 = arith.addf %2, %4 : vector<8x64xf32>
    %cst_5 = arith.constant 0.000000e+00 : f32
    %6 = vector.broadcast %cst_5 : f32 to vector<8x64xf32>
    %7 = arith.maximumf %5, %6 : vector<8x64xf32>
    %c0_6 = arith.constant 0 : index
    %c0_7 = arith.constant 0 : index
    %8 = vector.load %arg3[%c0_6, %c0_7] : memref<64x32xf32, #tpu.memory_space<vmem>>, vector<64x32xf32>
    %cst_8 = arith.constant dense<0.000000e+00> : vector<8x32xf32>
    %9 = tpu.matmul %7, %8, %cst_8 {dimension_numbers = #tpu.dot_dimension_numbers<[1], [0], [0], [1], [0, 0, 1, 1], [], []>} : vector<8x64xf32>, vector<64x32xf32>, vector<8x32xf32> -> vector<8x32xf32>
    %c0_9 = arith.constant 0 : index
    %c64 = arith.constant 64 : index
    %10 = vector.load %arg5[%c0_9, %c64] : memref<1x97xf32, #tpu.memory_space<vmem>>, vector<1x32xf32>
    %11 = vector.broadcast %10 : vector<1x32xf32> to vector<8x32xf32>
    %12 = arith.addf %9, %11 : vector<8x32xf32>
    %cst_10 = arith.constant 0.000000e+00 : f32
    %13 = vector.broadcast %cst_10 : f32 to vector<8x32xf32>
    %14 = arith.maximumf %12, %13 : vector<8x32xf32>
    %c0_11 = arith.constant 0 : index
    %c0_12 = arith.constant 0 : index
    %15 = vector.load %arg4[%c0_11, %c0_12] : memref<1x32xf32, #tpu.memory_space<vmem>>, vector<1x32xf32>
    %16 = vector.broadcast %15 : vector<1x32xf32> to vector<8x32xf32>
    %17 = arith.mulf %14, %16 : vector<8x32xf32>
    %cst_13 = arith.constant dense<0.000000e+00> : vector<8xf32>
    %18 = vector.multi_reduction <add>, %17, %cst_13 [1] : vector<8x32xf32> to vector<8xf32>
    %19 = vector.shape_cast %18 : vector<8xf32> to vector<8x1xf32>
    %c0_14 = arith.constant 0 : index
    %c96 = arith.constant 96 : index
    %20 = vector.load %arg5[%c0_14, %c96] : memref<1x97xf32, #tpu.memory_space<vmem>>, vector<1x1xf32>
    %21 = vector.broadcast %20 : vector<1x1xf32> to vector<8x1xf32>
    %22 = arith.addf %19, %21 : vector<8x1xf32>
    %c0_15 = arith.constant 0 : index
    %c0_16 = arith.constant 0 : index
    %23 = vector.load %arg6[%c0_15, %c0_16] : memref<8x1xf32, #tpu.memory_space<vmem>>, vector<8x1xf32>
    tpu.vector_store %arg6[%c0_15, %c0_16], %22 {strides = array<i32>} : memref<8x1xf32, #tpu.memory_space<vmem>>, vector<8x1xf32>,
    return
  }
  func.func @transform_0(%arg0: i32) -> (i32, i32) {
    %c0_i32 = arith.constant 0 : i32
    %c0_i32_0 = arith.constant 0 : i32
    return %arg0, %c0_i32 : i32, i32
  }
  func.func @transform_1(%arg0: i32) -> (i32, i32) {
    %c0_i32 = arith.constant 0 : i32
    %c0_i32_0 = arith.constant 0 : i32
    %c0_i32_1 = arith.constant 0 : i32
    return %c0_i32, %c0_i32_0 : i32, i32
  }
  func.func @transform_2(%arg0: i32) -> (i32, i32) {
    %c0_i32 = arith.constant 0 : i32
    %c0_i32_0 = arith.constant 0 : i32
    %c0_i32_1 = arith.constant 0 : i32
    return %c0_i32, %c0_i32_0 : i32, i32
  }
  func.func @transform_3(%arg0: i32) -> (i32, i32) {
    %c0_i32 = arith.constant 0 : i32
    %c0_i32_0 = arith.constant 0 : i32
    %c0_i32_1 = arith.constant 0 : i32
    return %c0_i32, %c0_i32_0 : i32, i32
  }
  func.func @transform_4(%arg0: i32) -> (i32, i32) {
    %c0_i32 = arith.constant 0 : i32
    %c0_i32_0 = arith.constant 0 : i32
    %c0_i32_1 = arith.constant 0 : i32
    return %c0_i32, %c0_i32_0 : i32, i32
  }
  func.func @transform_5(%arg0: i32) -> (i32, i32) {
    %c0_i32 = arith.constant 0 : i32
    %c0_i32_0 = arith.constant 0 : i32
    return %arg0, %c0_i32 : i32, i32
  }
}

</mosaic_0001>

<bundles_post_ra>
// kernel: tpu_custom_call.1
= control target key start
LH: loop header
LB: loop body
LE: loop exit
PB: predicated region body
PF: predicated region fallthrough
CT: control target
= control target key end

     0   :  { %vm28_vm0 = vcmask 195584   ;;  %vm64_vm1 = vcmask 523264   ;;  %vm94_vm2 = vcmask 261120   ;;  %vm103_vm3 = vcmask 7168   ;;  %s192_s1 = inlined_call_operand.vmem [shape: f32[24,64], index: 1, kind: input, shape index: {}]   ;;  %s193_s2 = inlined_call_operand.vmem [shape: f32[64,32], index: 2, kind: input, shape index: {}]   ;;  %s194_s0 = inlined_call_operand.vmem [shape: f32[8,24], index: 0, kind: input, shape index: {}]   ;;  %s195_s4 = inlined_call_operand.vmem [shape: f32[1,97], index: 4, kind: input, shape index: {}]   ;;  %s196_s3 = inlined_call_operand.vmem [shape: f32[1,32], index: 3, kind: input, shape index: {}]   ;;  %s197_s5 = inlined_call_operand.vmem [shape: f32[8,1], index: 5, kind: output, shape index: {}]  }
   0x1   :  { %v23_v0 = vld [vmem:[%s192_s1 + $0x10] sm:$0xff]  ;;  %v22_v1 = vld [vmem:[%s192_s1 + $0x8] sm:$0xff]  ;;  %v60_v2 = vld [vmem:[%s193_s2 + $0x38] sm:$0xff] }
   0x2   :  { %45 = vmatpush.msra.mxu0 %v23_v0  ;;  %v59_v3 = vld [vmem:[%s193_s2 + $0x30] sm:$0xff]  ;;  %v21_v4 = vld [vmem:[%s192_s1] sm:$0xff]  ;;  %76 = vmatpush.msra.mxu1 %v60_v2  ;;  %v58_v6 = vld [vmem:[%s193_s2 + $0x28] sm:$0xff] }
   0x3   :  { %v20_v5 = vld [vmem:[%s194_s0] sm:$0xff]  ;;  %v56_v8 = vld [vmem:[%s193_s2 + $0x18] sm:$0xff]  ;;  %s115_s0 = smov 64   ;;  %v55_v10 = vld [vmem:[%s193_s2 + $0x10] sm:$0xff] }
   0x4   :  { %46 = vmatpush.msra.mxu0 %v22_v1  ;;  %77 = vmatpush.msra.mxu1 %v59_v3  ;;  %v57_v7 = vld [vmem:[%s193_s2 + $0x20] sm:$0xff]  ;;  %v54_v11 = vld [vmem:[%s193_s2 + $0x8] sm:$0xff] }
   0x5   :  { %v113_v9 = vld [vmem:[%s195_s4] ss:$0 sm:$0xff] }
   0x6   :  { %47 = vmatpush.msra.mxu0 %v21_v4  ;;  %78 = vmatpush.msra.mxu1 %v58_v6  ;;  %v53_v12 = vld [vmem:[%s193_s2] sm:$0xff]  ;;  %s116_s2 = smov 32  }
   0x7   :  { %109 = vmatmul.msk.f32.vlgmr.msra.gmra.mxu0 %vm28_vm0, %v20_v5  ;;  %61 = vrot.lane.b32.xlu0 %v113_v9, %s115_s0  ;;  %v114_v19 = vld [vmem:[%s196_s3] ss:$0 sm:$0xff] }
   0x8   :  { %79 = vmatpush.msra.mxu1 %v57_v7 }
   0xa   :  { %80 = vmatpush.msra.mxu1 %v56_v8 }
   0xc   :  { %81 = vmatpush.msra.mxu1 %v55_v10 }
   0xe   :  { %82 = vmatpush.msra.mxu1 %v54_v11 }
  0x10   :  { %83 = vmatpush.msra.mxu1 %v53_v12 }
  0x79   :  { %v62_v16 = vpop.permute.xlu0 %61 }
  0x84   :  { %v49_v13 = vpop.f32.mrf.mxu0 }
  0x85   :  { %v50_v14 = vadd.f32 %v113_v9, %v49_v13 }
  0x87   :  { %v52_v15 = vmax.f32 %v50_v14, 0.0 }
  0x89   :  { %110 = vmatmul.msk.f32.vlgmr.msra.gmra.mxu1 %vm64_vm1, %v52_v15 }
 0x106   :  { %v85_v17 = vpop.f32.mrf.mxu1 }
 0x107   :  { %v86_v18 = vadd.f32 %v85_v17, %v62_v16 }
 0x109   :  { %v88_v20 = vmax.f32 %v86_v18, 0.0 }
 0x10b   :  { %v93_v21 = vmul.f32 %v114_v19, %v88_v20 }
 0x10d   :  { %v95_v22 = vsel %vm94_vm2, %v93_v21, 0.0 }
 0x10e   :  { %96 = vadd.xlane.f32.xlu0 %v95_v22 }
 0x181   :  { %v97_v23 = vpop.xlane.xlu0 %96 }
 0x182   :  { %v98_v24 = vadd.f32 %v113_v9, %v97_v23 }
 0x184   :  { %100 = vrot.lane.b32.xlu1 %v98_v24, %s116_s2 }
 0x1f6   :  { %v101_v25 = vpop.permute.xlu1 %100 }
 0x1f7   :  { %104 = vst.msk [vmem:[%s197_s5] sm:$0xff] %vm103_vm3, %v101_v25 }

</bundles_post_ra>
